<compile_context>
chip_gen: v6e
topology: v6e:2x2x1
jax: 0.10.0
libtpu: 0.0.40
codegen_flags: <defaults>
</compile_context>

<pallas_src>
import functools

import jax
import jax.numpy as jnp
from jax.experimental import pallas as pl
from jax.experimental.pallas import tpu as pltpu

LANES = 128
ACC_ROWS = 8                          # sublane height of the per-partition accumulator
BLOCK_BYTES = 2 * 1024 * 1024         # HBM bytes per input per grid step
VMEM_LIMIT_BYTES = 32 * 1024 * 1024   # explicit scoped-VMEM limit (safe on v5e/v6e/v7x)


def _mse_partial_kernel(x_ref, t_ref, acc_ref, *,
                        tile_rows, acc_rows, valid_rows,
                        blocks_per_part, needs_mask):
    """Accumulate sublane partial sums of (x - t)^2 into the resident acc block."""
    c = pl.program_id(0)            # partition (maps to a TensorCore on v7x)
    k = pl.program_id(1)            # block index within the partition
    gi = c * blocks_per_part + k    # global row-block index
    row_start = gi * tile_rows

    @pl.when(k == 0)
    def _init():
        acc_ref[...] = jnp.zeros_like(acc_ref)

    d = x_ref[...].astype(jnp.float32) - t_ref[...].astype(jnp.float32)

    def fold(dd):
        # (tile_rows, L) -> (acc_rows, L) sublane partial sums (pure VPU adds,
        # hidden under the two input DMAs).
        sq = dd * dd
        if tile_rows == acc_rows:
            return sq
        return jnp.sum(
            sq.reshape(tile_rows // acc_rows, acc_rows, sq.shape[-1]), axis=0)

    if needs_mask:
        # Full blocks (the common case): plain accumulate.
        @pl.when(row_start + tile_rows <= valid_rows)
        def _full():
            acc_ref[...] += fold(d)[None]

        # The single partial block: zero out-of-range rows with a select
        # (undefined padded bits could be NaN/Inf, so never a 0/1 multiply).
        @pl.when(jnp.logical_and(row_start < valid_rows,
                                 row_start + tile_rows > valid_rows))
        def _partial():
            row = jax.lax.broadcasted_iota(jnp.int32, d.shape, 0) + row_start
            dm = jnp.where(row < valid_rows, d, jnp.float32(0.0))
            acc_ref[...] += fold(dm)[None]

        # Blocks with row_start >= valid_rows exist only as grid padding for
        # the 2-partition split; they contribute nothing.
    else:
        acc_ref[...] += fold(d)[None]


def content_loss_forward(x, target):
    """Replicates Contentloss.forward: returns (input unchanged, mse_loss).

    Mixed input/target dtypes are accepted; both are cast to f32 in-kernel.
    """
    assert x.shape == target.shape, "input / target shape mismatch"
    n_elem = x.size
    assert n_elem > 0, "empty input"

    # Zero-copy 2D views.  Prefer a lane-dense (rows, 128) view; when the
    # element count is not a 128-multiple, fall back to (-1, last_dim) so no
    # HBM-side pad / concatenate is ever issued.
    lanes = LANES if n_elem % LANES == 0 else x.shape[-1]
    rows = n_elem // lanes
    xv = x.reshape(rows, lanes)
    tv = target.reshape(rows, lanes)

    # Tile rows by a byte budget so f32 and bf16 move the same bytes per step.
    itemsize = max(jnp.dtype(x.dtype).itemsize, jnp.dtype(target.dtype).itemsize)
    lanes_padded = ((lanes + LANES - 1) // LANES) * LANES    # VMEM lane padding
    cap_rows = max(ACC_ROWS,
                   (BLOCK_BYTES // (lanes_padded * itemsize)) // ACC_ROWS * ACC_ROWS)
    tile_rows = rows if rows <= cap_rows else cap_rows
    acc_rows = ACC_ROWS if tile_rows % ACC_ROWS == 0 else tile_rows

    num_blocks = pl.cdiv(rows, tile_rows)
    num_parts = 2 if num_blocks >= 2 else 1
    blocks_per_part = pl.cdiv(num_blocks, num_parts)
    needs_mask = (num_parts * blocks_per_part * tile_rows) != rows
    last_block = num_blocks - 1

    def in_index_map(c, k):
        # Clamp grid-padding steps (odd block count split over 2 partitions)
        # to a valid block; their contribution is skipped inside the kernel.
        return (jnp.minimum(c * blocks_per_part + k, last_block), 0)

    kernel = functools.partial(
        _mse_partial_kernel,
        tile_rows=tile_rows,
        acc_rows=acc_rows,
        valid_rows=rows,
        blocks_per_part=blocks_per_part,
        needs_mask=needs_mask,
    )

    partials = pl.pallas_call(
        kernel,
        out_shape=jax.ShapeDtypeStruct((num_parts, acc_rows, lanes), jnp.float32),
        grid_spec=pltpu.PrefetchScalarGridSpec(
            num_scalar_prefetch=0,
            grid=(num_parts, blocks_per_part),
            in_specs=[
                pl.BlockSpec((tile_rows, lanes), in_index_map),
                pl.BlockSpec((tile_rows, lanes), in_index_map),
            ],
            out_specs=pl.BlockSpec((1, acc_rows, lanes), lambda c, k: (c, 0, 0)),
        ),
        compiler_params=pltpu.CompilerParams(
            dimension_semantics=("parallel", "arbitrary"),
            vmem_limit_bytes=VMEM_LIMIT_BYTES,
        ),
        cost_estimate=pl.CostEstimate(
            flops=3 * n_elem,
            transcendentals=0,
            bytes_accessed=n_elem * (jnp.dtype(x.dtype).itemsize
                                     + jnp.dtype(target.dtype).itemsize)
            + num_parts * acc_rows * lanes * 4,
        ),
    )(xv, tv)

    # Tiny final reduction (num_parts * 8 * lanes elements) + 1/N scale.
    loss = jnp.sum(partials) * jnp.float32(1.0 / float(n_elem))

    # forward() returns the input unchanged; the loss is the stored side value.
    return x, loss


if __name__ == "__main__":
    key = jax.random.PRNGKey(0)
    k1, k2, k3, k4, k5, k6 = jax.random.split(key, 6)

    # Small NCHW feature maps, consistent with a content-loss hook on conv features.
    x = jax.random.normal(k1, (2, 4, 16, 16), dtype=jnp.float32)
    target = jax.random.normal(k2, (2, 4, 16, 16), dtype=jnp.float32)
    out, loss = content_loss_forward(x, target)
    out = jax.block_until_ready(out)
    loss = jax.block_until_ready(loss)
    ref = jnp.mean((x - target) ** 2)
    assert jnp.allclose(loss, ref, rtol=1e-5, atol=1e-6), (loss, ref)
    assert jnp.array_equal(out, x)

    # bf16 ragged path (element count not a multiple of 128): zero-copy
    # (-1, 130) view, single block, no HBM-side padding or masking.
    xb = jax.random.normal(k3, (1, 8, 130, 130), dtype=jnp.bfloat16)
    tb = jax.random.normal(k4, (1, 8, 130, 130), dtype=jnp.bfloat16)
    _, loss_b = content_loss_forward(xb, tb)
    loss_b = jax.block_until_ready(loss_b)
    ref_b = jnp.mean((xb.astype(jnp.float32) - tb.astype(jnp.float32)) ** 2)
    assert jnp.allclose(loss_b, ref_b, rtol=1e-3, atol=1e-4), (loss_b, ref_b)

    # Multi-block path: odd block count split over the 2 grid partitions,
    # exercising the partial-block mask, the skipped padding block and the
    # clamped DMA index.
    xm = jax.random.normal(k5, (9192, 128), dtype=jnp.float32)
    tm = jax.random.normal(k6, (9192, 128), dtype=jnp.float32)
    _, loss_m = content_loss_forward(xm, tm)
    loss_m = jax.block_until_ready(loss_m)
    ref_m = jnp.mean((xm - tm) ** 2)
    assert jnp.allclose(loss_m, ref_m, rtol=1e-5, atol=1e-6), (loss_m, ref_m)

    print("KERNEL_OK")
</pallas_src>

<mosaic_0001>
module attributes {stable_mosaic.version = 11 : i64} {
  func.func @_mse_partial_kernel(%arg0: i32, %arg1: i32, %arg2: memref<16x128xf32, #tpu.memory_space<vmem>>, %arg3: memref<16x128xf32, #tpu.memory_space<vmem>>, %arg4: memref<1x8x128xf32, #tpu.memory_space<vmem>>) attributes {dimension_semantics = [#tpu.dimension_semantics<parallel>, #tpu.dimension_semantics<arbitrary>], iteration_bounds = array<i64: 1, 1>, scalar_prefetch = 0 : i64, scratch_operands = 0 : i64, tpu.core_type = #tpu.core_type<tc>, window_params = [{transform_indices = @transform_0, window_bounds = array<i64: 16, 128>}, {transform_indices = @transform_1, window_bounds = array<i64: 16, 128>}, {transform_indices = @transform_2, window_bounds = array<i64: 1, 8, 128>}]} {
    %c0_i32 = arith.constant 0 : i32
    %0 = arith.cmpi eq, %arg1, %c0_i32 : i32
    %1 = arith.extui %0 : i1 to i32
    %c0_i32_0 = arith.constant 0 : i32
    %2 = arith.cmpi ne, %1, %c0_i32_0 : i32
    scf.if %2 {
      %cst_10 = arith.constant 0.000000e+00 : f32
      %13 = vector.broadcast %cst_10 : f32 to vector<1x8x128xf32>
      %c0_11 = arith.constant 0 : index
      %c0_12 = arith.constant 0 : index
      %c0_13 = arith.constant 0 : index
      %14 = vector.load %arg4[%c0_11, %c0_12, %c0_13] : memref<1x8x128xf32, #tpu.memory_space<vmem>>, vector<1x8x128xf32>
      tpu.vector_store %arg4[%c0_11, %c0_12, %c0_13], %13 {strides = array<i32>} : memref<1x8x128xf32, #tpu.memory_space<vmem>>, vector<1x8x128xf32>,
    } else {
    }
    %c0 = arith.constant 0 : index
    %c0_1 = arith.constant 0 : index
    %3 = vector.load %arg2[%c0, %c0_1] : memref<16x128xf32, #tpu.memory_space<vmem>>, vector<16x128xf32>
    %c0_2 = arith.constant 0 : index
    %c0_3 = arith.constant 0 : index
    %4 = vector.load %arg3[%c0_2, %c0_3] : memref<16x128xf32, #tpu.memory_space<vmem>>, vector<16x128xf32>
    %5 = arith.subf %3, %4 : vector<16x128xf32>
    %c0_4 = arith.constant 0 : index
    %c0_5 = arith.constant 0 : index
    %c0_6 = arith.constant 0 : index
    %6 = vector.load %arg4[%c0_4, %c0_5, %c0_6] : memref<1x8x128xf32, #tpu.memory_space<vmem>>, vector<1x8x128xf32>
    %7 = arith.mulf %5, %5 : vector<16x128xf32>
    %8 = vector.shape_cast %7 : vector<16x128xf32> to vector<2x8x128xf32>
    %cst = arith.constant dense<0.000000e+00> : vector<8x128xf32>
    %9 = vector.multi_reduction <add>, %8, %cst [0] : vector<2x8x128xf32> to vector<8x128xf32>
    %10 = vector.shape_cast %9 : vector<8x128xf32> to vector<1x8x128xf32>
    %11 = arith.addf %6, %10 : vector<1x8x128xf32>
    %c0_7 = arith.constant 0 : index
    %c0_8 = arith.constant 0 : index
    %c0_9 = arith.constant 0 : index
    %12 = vector.load %arg4[%c0_7, %c0_8, %c0_9] : memref<1x8x128xf32, #tpu.memory_space<vmem>>, vector<1x8x128xf32>
    tpu.vector_store %arg4[%c0_7, %c0_8, %c0_9], %11 {strides = array<i32>} : memref<1x8x128xf32, #tpu.memory_space<vmem>>, vector<1x8x128xf32>,
    return
  }
  func.func @transform_0(%arg0: i32, %arg1: i32) -> (i32, i32) {
    %c1_i32 = arith.constant 1 : i32
    %0 = arith.muli %arg0, %c1_i32 : i32
    %1 = arith.addi %0, %arg1 : i32
    %c0_i32 = arith.constant 0 : i32
    %2 = arith.minsi %1, %c0_i32 : i32
    %c0_i32_0 = arith.constant 0 : i32
    %c0_i32_1 = arith.constant 0 : i32
    return %2, %c0_i32_0 : i32, i32
  }
  func.func @transform_1(%arg0: i32, %arg1: i32) -> (i32, i32) {
    %c1_i32 = arith.constant 1 : i32
    %0 = arith.muli %arg0, %c1_i32 : i32
    %1 = arith.addi %0, %arg1 : i32
    %c0_i32 = arith.constant 0 : i32
    %2 = arith.minsi %1, %c0_i32 : i32
    %c0_i32_0 = arith.constant 0 : i32
    %c0_i32_1 = arith.constant 0 : i32
    return %2, %c0_i32_0 : i32, i32
  }
  func.func @transform_2(%arg0: i32, %arg1: i32) -> (i32, i32, i32) {
    %c0_i32 = arith.constant 0 : i32
    %c0_i32_0 = arith.constant 0 : i32
    %c0_i32_1 = arith.constant 0 : i32
    return %arg0, %c0_i32, %c0_i32_0 : i32, i32, i32
  }
}

</mosaic_0001>

<bundles_post_ra>
// kernel: tpu_custom_call.1
= control target key start
LH: loop header
LB: loop body
LE: loop exit
PB: predicated region body
PF: predicated region fallthrough
CT: control target
= control target key end

     0   :  { %7 = vsyncpa [#allocation3], 0  ;;  %s198_s0 = inlined_call_operand.hbm [shape: f32[16,128], index: 0, kind: input, shape index: {}]   ;;  %s199_s1 = inlined_call_operand.hbm [shape: f32[16,128], index: 1, kind: input, shape index: {}]   ;;  %s200_s2 = inlined_call_operand.hbm [shape: f32[1,8,128], index: 2, kind: output, shape index: {}]  }
   0x1   :  { %8 = vsyncpa [#allocation6], 0 }
   0x2   :  { %9 = vsyncpa [#allocation4], 0  ;;  %s169_s9 = smov [#allocation2]  }
   0x3   :  { %s21_s10 = sshll.u32 %s169_s9, 4  ;;  %s22_s10 = int_to_ptr.vmem [resolvable:$true] %s21_s10 }
   0x4   :  { %s111_s11 = scalar_lea.vmem %s22_s10, 256  ;;  %p116_p1 = scmp.lt.s32.totalorder %s22_s10, %s22_s10 }
   0x5   :  { %p112_p0 = scmp.ne.s32.totalorder %s22_s10, %s111_s11  ;;  %p117_p2 = scmp.lt.s32.totalorder %s111_s11, %s111_s11 }
   0x7   :  { %p118_p3 = por %p117_p2, %p116_p1 }
   0x9   :  { %p119_p4 = pnand %p118_p3, %p112_p0 }
   0xb   :  { %122 = shalt.err (!%p119_p4)
}
   0xc   :  { %s170_s12 = smov 128   ;;  %s171_s13 = smov 8  }
   0xd   :  { %27 = dma.hbm_to_vmem [thread:$0]  %s198_s0, 256, %s22_s10, [#allocation3], %s170_s12, %s170_s12, %s171_s13  }
   0xe   :  { %s172_s16 = smov [#allocation5]  }
   0xf   :  { %s39_s17 = sshll.u32 %s172_s16, 4  ;;  %s40_s17 = int_to_ptr.vmem [resolvable:$true] %s39_s17 }
  0x10   :  { %s131_s18 = scalar_lea.vmem %s40_s17, 256  ;;  %p136_p6 = scmp.lt.s32.totalorder %s40_s17, %s40_s17 }
  0x11   :  { %p132_p5 = scmp.ne.s32.totalorder %s40_s17, %s131_s18  ;;  %p137_p7 = scmp.lt.s32.totalorder %s131_s18, %s131_s18 }
  0x13   :  { %p138_p8 = por %p137_p7, %p136_p6 }
  0x15   :  { %p139_p9 = pnand %p138_p8, %p132_p5 }
  0x17   :  { %142 = shalt.err (!%p139_p9)
}
  0x18   :  { %45 = dma.hbm_to_vmem [thread:$0]  %s199_s1, 256, %s40_s17, [#allocation6], %s170_s12, %s170_s12, %s171_s13  }
  0x19   :  { %163 = dma.done.wait [#allocation3], 256  }
  0x1a   :  { %164 = vsyncadd [#allocation3], 4294967040 }
  0x1b   :  { %165 = dma.done.wait [#allocation6], 256  }
  0x1c   :  { %166 = vsyncadd [#allocation6], 4294967040  ;;  %v65_v0 = vld [vmem:[#allocation2] sm:$0xff]  ;;  %v66_v1 = vld [vmem:[#allocation2 + $0x8] sm:$0xff]  ;;  %s173_s0 = smov [#allocation7]  }
  0x1d   :  { %v67_v2 = vld [vmem:[#allocation5] sm:$0xff]  ;;  %v68_v3 = vld [vmem:[#allocation5 + $0x8] sm:$0xff]  ;;  %s83_s21 = sshll.u32 %s173_s0, 4  ;;  %s84_s21 = int_to_ptr.vmem [resolvable:$true] %s83_s21 }
  0x1e   :  { %v69_v4 = vsub.f32 %v65_v0, %v67_v2  ;;  %v70_v5 = vsub.f32 %v66_v1, %v68_v3  ;;  %s143_s22 = scalar_lea.vmem %s84_s21, 128  ;;  %p148_p11 = scmp.lt.s32.totalorder %s84_s21, %s84_s21 }
  0x1f   :  { %p144_p10 = scmp.ne.s32.totalorder %s84_s21, %s143_s22  ;;  %p149_p12 = scmp.lt.s32.totalorder %s143_s22, %s143_s22 }
  0x20   :  { %v72_v6 = vmul.f32 %v69_v4, %v69_v4  ;;  %v73_v7 = vmul.f32 %v70_v5, %v70_v5 }
  0x21   :  { %p150_p13 = por %p149_p12, %p148_p11 }
  0x22   :  { %v74_v8 = vadd.f32 %v73_v7, %v72_v6 }
  0x23   :  { %p151_p0 = pnand %p150_p13, %p144_p10 }
  0x24   :  { %76 = vst [vmem:[#allocation7] sm:$0xff] %v74_v8 }
  0x25   :  { %154 = shalt.err (!%p151_p0)
}
  0x26   :  { %86 = dma.vmem_to_hbm [thread:$0]  %s84_s21, 128, %s200_s2, [#allocation4]  }
  0x27   :  { %167 = dma.done.wait [#allocation4], 128  }
  0x28   :  { %168 = vsyncadd [#allocation4], 4294967168 }
  0x29   :  { %90 = vsyncpa [#allocation3], 1 }
  0x2a   :  { %91 = vsyncpa [#allocation6], 1 }
  0x2b   :  { %92 = vsyncpa [#allocation4], 1 }

</bundles_post_ra>
